<compile_context>
chip_gen: v5e
topology: v5e:2x2
jax: 0.10.0
libtpu: 0.0.40
codegen_flags: <defaults>
</compile_context>

<pallas_src>
import functools

import jax
import jax.numpy as jnp
from jax.experimental import pallas as pl
from jax.experimental.pallas import tpu as pltpu


def _round_up(x, m):
    return ((x + m - 1) // m) * m


def _softplus(x):
    # Numerically-stable softplus, elementwise (VPU + EUP), f32.
    return jnp.maximum(x, 0.0) + jnp.log(1.0 + jnp.exp(-jnp.abs(x)))


def _gamma_1p(x):
    # Gamma(1 + x) for x in [0, 1] via Abramowitz & Stegun 6.1.36 polynomial
    # (|err| <= 3e-7).  exp(lgamma(1+k)) has no direct Mosaic lowering.
    # NOTE: the poly is only valid on [0, 1] -- correctness relies on the
    # wei_shape_max == 1.0 clamp and the 1e-30 floor applied to k below.
    c1 = -0.577191652
    c2 = 0.988205891
    c3 = -0.897056937
    c4 = 0.918206857
    c5 = -0.756704078
    c6 = 0.482199394
    c7 = -0.193527818
    c8 = 0.035868343
    return 1.0 + x * (c1 + x * (c2 + x * (c3 + x * (c4 + x * (c5 + x * (c6 + x * (c7 + x * c8)))))))


def invarient_kernel(h_ref, w_ref, b_ref, out_ref, *, c):
    real_min = 1e-30
    wei_shape_max = 1.0

    # Fused pool + shape|scale encoder: the wrapper pre-tiled the (D, 2C)
    # weight to (S*D, 2C) and divided by S, so this single lane-dense dot
    # equals mean(h.view(-1,S,D), axis=1) @ [Ws | Wl].  f32 in, f32 accumulate.
    z = jnp.dot(h_ref[...], w_ref[...],
                preferred_element_type=jnp.float32) + b_ref[...]      # (TN, 2C)
    # TODO(synk): nn.Dropout(0.2) is identity in eval mode; training-mode mask not applied.

    sp = jnp.maximum(_softplus(z), real_min)

    k_tmp = sp[:, :c]
    l_tmp = sp[:, c:]
    context_k = jnp.minimum(k_tmp, wei_shape_max)        # in (0, 1]

    # context_l = l_tmp / Gamma(1 + k).  approx reciprocal -> EUP vrcp slot
    # (~1e-4 rel err, larger than the 3e-7 gamma-poly err; acceptable here).
    gamma_1pk = _gamma_1p(context_k)
    context_l = l_tmp * pl.reciprocal(gamma_1pk, approx=True)

    # Three static sub-slice stores into one (TN, 3C) slab = [k | l | l_tmp]
    # (avoids the lane-shuffle concatenate).
    out_ref[:, :c] = context_k
    out_ref[:, c:2 * c] = context_l
    out_ref[:, 2 * c:] = l_tmp


def invarient_net_forward(h, w_shape, b_shape, w_scale, b_scale,
                          sample_size, hidden_dim):
    c = w_shape.shape[-1]
    sd = sample_size * hidden_dim

    # pool-fold: h.view(-1, S, D).mean(1) @ W  ==  h.view(-1, S*D) @ (tile(W, S)/S)
    # Row-major reshape is free (no HBM copy); no wrapper-side dtype cast.
    h2 = h.reshape(-1, sd)
    n = h2.shape[0]

    w_fused = jnp.concatenate([w_shape, w_scale], axis=-1)                # (D, 2C)
    w_fused = (jnp.tile(w_fused, (sample_size, 1)) /
               float(sample_size)).astype(jnp.float32)                   # (S*D, 2C)
    b_fused = jnp.concatenate(
        [b_shape.reshape(1, c), b_scale.reshape(1, c)],
        axis=-1).astype(jnp.float32)                                      # (1, 2C)

    # Tile over the group axis: large streaming tiles (up to 4096 rows),
    # 8-aligned, and capped at ~ceil(N/2) so a 2-TC v7x chip gets >= 2 grid
    # steps to shard.  Ragged tail handled by a partial boundary block (rows
    # are independent; padded rows are discarded by out[:n]).
    tn = min(4096, max(8, _round_up(pl.cdiv(n, 2), 8)))
    grid = (pl.cdiv(n, tn),)

    # VMEM budget at TN=4096: h 2*4096*sd*4 ~= 8 MiB (sd=256), out ~1.5 MiB,
    # weights negligible -> ~10 MiB; 32 MiB raises v5e's 16 MiB scoped default
    # and stays within v7x's 64 MiB physical VMEM.
    out_shape = jax.ShapeDtypeStruct((n, 3 * c), jnp.float32)

    out = pl.pallas_call(
        functools.partial(invarient_kernel, c=c),
        out_shape=out_shape,
        grid_spec=pltpu.PrefetchScalarGridSpec(
            num_scalar_prefetch=0,
            grid=grid,
            in_specs=[
                pl.BlockSpec((tn, sd), lambda i: (i, 0)),
                pl.BlockSpec((sd, 2 * c), lambda i: (0, 0)),
                pl.BlockSpec((1, 2 * c), lambda i: (0, 0)),
            ],
            out_specs=pl.BlockSpec((tn, 3 * c), lambda i: (i, 0)),
        ),
        compiler_params=pltpu.CompilerParams(
            dimension_semantics=("parallel",),
            vmem_limit_bytes=32 * 1024 * 1024),
    )(h2, w_fused, b_fused)

    context_k_rec = out[:, :c]
    context_l = out[:, c:2 * c]
    l_tmp = out[:, 2 * c:]
    return context_k_rec, context_l, l_tmp


if __name__ == "__main__":
    # Small shapes consistent with the module.
    sample_size = 8
    hidden_dim = 32
    hidden_c = 16
    batch_groups = 2

    key = jax.random.PRNGKey(0)
    k_h, k_ws, k_wl = jax.random.split(key, 3)

    # Input h: anything reshapeable to (-1, sample_size, hidden_dim).
    h = jax.random.normal(
        k_h, (batch_groups * sample_size, hidden_dim), dtype=jnp.float32)

    # Deterministic Conv1D(rf=1) params: normal(std=0.02) weights, zero biases.
    w_shape = 0.02 * jax.random.normal(k_ws, (hidden_dim, hidden_c), dtype=jnp.float32)
    b_shape = jnp.zeros((hidden_c,), dtype=jnp.float32)
    w_scale = 0.02 * jax.random.normal(k_wl, (hidden_dim, hidden_c), dtype=jnp.float32)
    b_scale = jnp.zeros((hidden_c,), dtype=jnp.float32)

    context_k_rec, context_l, l_tmp = invarient_net_forward(
        h, w_shape, b_shape, w_scale, b_scale, sample_size, hidden_dim)

    jax.block_until_ready((context_k_rec, context_l, l_tmp))

    assert context_k_rec.shape == (batch_groups, hidden_c)
    assert context_l.shape == (batch_groups, hidden_c)
    assert l_tmp.shape == (batch_groups, hidden_c)
    print("KERNEL_OK")
</pallas_src>

<mosaic_0001>
module attributes {stable_mosaic.version = 11 : i64} {
  func.func @invarient_kernel(%arg0: i32, %arg1: memref<8x256xf32, #tpu.memory_space<vmem>>, %arg2: memref<256x32xf32, #tpu.memory_space<vmem>>, %arg3: memref<1x32xf32, #tpu.memory_space<vmem>>, %arg4: memref<8x48xf32, #tpu.memory_space<vmem>>) attributes {dimension_semantics = [#tpu.dimension_semantics<parallel>], iteration_bounds = array<i64: 1>, scalar_prefetch = 0 : i64, scratch_operands = 0 : i64, tpu.core_type = #tpu.core_type<tc>, window_params = [{transform_indices = @transform_0, window_bounds = array<i64: 8, 256>}, {pipeline_mode = #tpu.pipeline_mode<synchronous>, transform_indices = @transform_1, window_bounds = array<i64: 256, 32>}, {pipeline_mode = #tpu.pipeline_mode<synchronous>, transform_indices = @transform_2, window_bounds = array<i64: 1, 32>}, {transform_indices = @transform_3, window_bounds = array<i64: 8, 48>}]} {
    %c0 = arith.constant 0 : index
    %c0_0 = arith.constant 0 : index
    %0 = vector.load %arg1[%c0, %c0_0] : memref<8x256xf32, #tpu.memory_space<vmem>>, vector<8x256xf32>
    %c0_1 = arith.constant 0 : index
    %c0_2 = arith.constant 0 : index
    %1 = vector.load %arg2[%c0_1, %c0_2] : memref<256x32xf32, #tpu.memory_space<vmem>>, vector<256x32xf32>
    %cst = arith.constant dense<0.000000e+00> : vector<8x32xf32>
    %2 = tpu.matmul %0, %1, %cst {dimension_numbers = #tpu.dot_dimension_numbers<[1], [0], [0], [1], [0, 0, 1, 1], [], []>} : vector<8x256xf32>, vector<256x32xf32>, vector<8x32xf32> -> vector<8x32xf32>
    %c0_3 = arith.constant 0 : index
    %c0_4 = arith.constant 0 : index
    %3 = vector.load %arg3[%c0_3, %c0_4] : memref<1x32xf32, #tpu.memory_space<vmem>>, vector<1x32xf32>
    %4 = vector.broadcast %3 : vector<1x32xf32> to vector<8x32xf32>
    %5 = arith.addf %2, %4 : vector<8x32xf32>
    %cst_5 = arith.constant 0.000000e+00 : f32
    %6 = vector.broadcast %cst_5 : f32 to vector<8x32xf32>
    %7 = arith.maximumf %5, %6 : vector<8x32xf32>
    %8 = math.absf %5 : vector<8x32xf32>
    %cst_6 = arith.constant 0.000000e+00 : f32
    %9 = vector.broadcast %cst_6 : f32 to vector<8x32xf32>
    %10 = arith.subf %9, %8 : vector<8x32xf32>
    %11 = math.exp %10 : vector<8x32xf32>
    %cst_7 = arith.constant 1.000000e+00 : f32
    %12 = vector.broadcast %cst_7 : f32 to vector<8x32xf32>
    %13 = arith.addf %12, %11 : vector<8x32xf32>
    %14 = math.log %13 : vector<8x32xf32>
    %15 = arith.addf %7, %14 : vector<8x32xf32>
    %cst_8 = arith.constant 1.000000e-30 : f32
    %16 = vector.broadcast %cst_8 : f32 to vector<8x32xf32>
    %17 = arith.maximumf %15, %16 : vector<8x32xf32>
    %18 = vector.extract_strided_slice %17 {offsets = [0, 0], sizes = [8, 16], strides = [1, 1]} : vector<8x32xf32> to vector<8x16xf32>
    %19 = vector.extract_strided_slice %17 {offsets = [0, 16], sizes = [8, 16], strides = [1, 1]} : vector<8x32xf32> to vector<8x16xf32>
    %cst_9 = arith.constant 1.000000e+00 : f32
    %20 = vector.broadcast %cst_9 : f32 to vector<8x16xf32>
    %21 = arith.minimumf %18, %20 : vector<8x16xf32>
    %cst_10 = arith.constant 0.035868343 : f32
    %22 = vector.broadcast %cst_10 : f32 to vector<8x16xf32>
    %23 = arith.mulf %21, %22 : vector<8x16xf32>
    %cst_11 = arith.constant -0.193527818 : f32
    %24 = vector.broadcast %cst_11 : f32 to vector<8x16xf32>
    %25 = arith.addf %24, %23 : vector<8x16xf32>
    %26 = arith.mulf %21, %25 : vector<8x16xf32>
    %cst_12 = arith.constant 0.482199401 : f32
    %27 = vector.broadcast %cst_12 : f32 to vector<8x16xf32>
    %28 = arith.addf %27, %26 : vector<8x16xf32>
    %29 = arith.mulf %21, %28 : vector<8x16xf32>
    %cst_13 = arith.constant -0.756704092 : f32
    %30 = vector.broadcast %cst_13 : f32 to vector<8x16xf32>
    %31 = arith.addf %30, %29 : vector<8x16xf32>
    %32 = arith.mulf %21, %31 : vector<8x16xf32>
    %cst_14 = arith.constant 0.91820687 : f32
    %33 = vector.broadcast %cst_14 : f32 to vector<8x16xf32>
    %34 = arith.addf %33, %32 : vector<8x16xf32>
    %35 = arith.mulf %21, %34 : vector<8x16xf32>
    %cst_15 = arith.constant -0.897056937 : f32
    %36 = vector.broadcast %cst_15 : f32 to vector<8x16xf32>
    %37 = arith.addf %36, %35 : vector<8x16xf32>
    %38 = arith.mulf %21, %37 : vector<8x16xf32>
    %cst_16 = arith.constant 0.988205909 : f32
    %39 = vector.broadcast %cst_16 : f32 to vector<8x16xf32>
    %40 = arith.addf %39, %38 : vector<8x16xf32>
    %41 = arith.mulf %21, %40 : vector<8x16xf32>
    %cst_17 = arith.constant -0.577191651 : f32
    %42 = vector.broadcast %cst_17 : f32 to vector<8x16xf32>
    %43 = arith.addf %42, %41 : vector<8x16xf32>
    %44 = arith.mulf %21, %43 : vector<8x16xf32>
    %cst_18 = arith.constant 1.000000e+00 : f32
    %45 = vector.broadcast %cst_18 : f32 to vector<8x16xf32>
    %46 = arith.addf %45, %44 : vector<8x16xf32>
    %47 = tpu.reciprocal %46 {approx = true} : vector<8x16xf32> -> vector<8x16xf32>
    %48 = arith.mulf %19, %47 : vector<8x16xf32>
    %c0_19 = arith.constant 0 : index
    %c0_20 = arith.constant 0 : index
    %49 = vector.load %arg4[%c0_19, %c0_20] : memref<8x48xf32, #tpu.memory_space<vmem>>, vector<8x16xf32>
    tpu.vector_store %arg4[%c0_19, %c0_20], %21 {strides = array<i32>} : memref<8x48xf32, #tpu.memory_space<vmem>>, vector<8x16xf32>,
    %c0_21 = arith.constant 0 : index
    %c16 = arith.constant 16 : index
    %50 = vector.load %arg4[%c0_21, %c16] : memref<8x48xf32, #tpu.memory_space<vmem>>, vector<8x16xf32>
    tpu.vector_store %arg4[%c0_21, %c16], %48 {strides = array<i32>} : memref<8x48xf32, #tpu.memory_space<vmem>>, vector<8x16xf32>,
    %c0_22 = arith.constant 0 : index
    %c32 = arith.constant 32 : index
    %51 = vector.load %arg4[%c0_22, %c32] : memref<8x48xf32, #tpu.memory_space<vmem>>, vector<8x16xf32>
    tpu.vector_store %arg4[%c0_22, %c32], %19 {strides = array<i32>} : memref<8x48xf32, #tpu.memory_space<vmem>>, vector<8x16xf32>,
    return
  }
  func.func @transform_0(%arg0: i32) -> (i32, i32) {
    %c0_i32 = arith.constant 0 : i32
    %c0_i32_0 = arith.constant 0 : i32
    return %arg0, %c0_i32 : i32, i32
  }
  func.func @transform_1(%arg0: i32) -> (i32, i32) {
    %c0_i32 = arith.constant 0 : i32
    %c0_i32_0 = arith.constant 0 : i32
    %c0_i32_1 = arith.constant 0 : i32
    return %c0_i32, %c0_i32_0 : i32, i32
  }
  func.func @transform_2(%arg0: i32) -> (i32, i32) {
    %c0_i32 = arith.constant 0 : i32
    %c0_i32_0 = arith.constant 0 : i32
    %c0_i32_1 = arith.constant 0 : i32
    return %c0_i32, %c0_i32_0 : i32, i32
  }
  func.func @transform_3(%arg0: i32) -> (i32, i32) {
    %c0_i32 = arith.constant 0 : i32
    %c0_i32_0 = arith.constant 0 : i32
    return %arg0, %c0_i32 : i32, i32
  }
}

</mosaic_0001>

<bundles_post_ra>
// kernel: tpu_custom_call.1
= control target key start
LH: loop header
LB: loop body
LE: loop exit
PB: predicated region body
PF: predicated region fallthrough
CT: control target
= control target key end

     0   :  { %8 = vsyncpa [#allocation3], 0  ;;  %vm143_vm0 = vcmask 130048   ;;  %vm145_vm1 = vcmask 261248   ;;  %vm151_vm2 = vcmask 392448   ;;  %s346_s0 = inlined_call_operand.vmem [shape: f32[2,256], index: 0, kind: input, shape index: {}]   ;;  %s347_s1 = inlined_call_operand.vmem [shape: f32[256,32], index: 1, kind: input, shape index: {}]   ;;  %s348_s2 = inlined_call_operand.vmem [shape: f32[1,32], index: 2, kind: input, shape index: {}]   ;;  %s349_s3 = inlined_call_operand.hbm [shape: f32[2,48], index: 3, kind: output, shape index: {}]  }
   0x1   :  { %v34_v0 = vld [vmem:[%s347_s1 + $0x78] sm:$0xff]  ;;  %v33_v1 = vld [vmem:[%s347_s1 + $0x70] sm:$0xff]  ;;  %v32_v4 = vld [vmem:[%s347_s1 + $0x68] sm:$0xff] }
   0x2   :  { %70 = vmatpush.msra.mxu0 %v34_v0  ;;  %v50_v2 = vld [vmem:[%s347_s1 + $0xf8] sm:$0xff]  ;;  %v49_v3 = vld [vmem:[%s347_s1 + $0xf0] sm:$0xff]  ;;  %v48_v5 = vld [vmem:[%s347_s1 + $0xe8] sm:$0xff] }
   0x3   :  { %90 = vmatpush.msra.mxu1 %v50_v2  ;;  %v31_v6 = vld [vmem:[%s347_s1 + $0x60] sm:$0xff]  ;;  %v30_v8 = vld [vmem:[%s347_s1 + $0x58] sm:$0xff]  ;;  %v29_v10 = vld [vmem:[%s347_s1 + $0x50] sm:$0xff] }
   0x4   :  { %71 = vmatpush.msra.mxu0 %v33_v1  ;;  %v47_v7 = vld [vmem:[%s347_s1 + $0xe0] sm:$0xff]  ;;  %v46_v9 = vld [vmem:[%s347_s1 + $0xd8] sm:$0xff]  ;;  %v45_v11 = vld [vmem:[%s347_s1 + $0xd0] sm:$0xff] }
   0x5   :  { %91 = vmatpush.msra.mxu1 %v49_v3  ;;  %v28_v12 = vld [vmem:[%s347_s1 + $0x48] sm:$0xff]  ;;  %v27_v13 = vld [vmem:[%s347_s1 + $0x40] sm:$0xff]  ;;  %v26_v20 = vld [vmem:[%s347_s1 + $0x38] sm:$0xff] }
   0x6   :  { %72 = vmatpush.msra.mxu0 %v32_v4  ;;  %v15_v14 = vld [vmem:[%s346_s0] sm:$0xf]  ;;  %v44_v15 = vld [vmem:[%s347_s1 + $0xc8] sm:$0xff]  ;;  %v16_v16 = vld [vmem:[%s346_s0 + $0x4] sm:$0xf] }
   0x7   :  { %92 = vmatpush.msra.mxu1 %v48_v5  ;;  %v17_v17 = vld [vmem:[%s346_s0 + $0x8] sm:$0xf]  ;;  %v18_v18 = vld [vmem:[%s346_s0 + $0xc] sm:$0xf]  ;;  %59 = vst [vmem:[#allocation1] ss:$4 sm:$0xff] %v15_v14 }
   0x8   :  { %73 = vmatpush.msra.mxu0 %v31_v6  ;;  %v43_v19 = vld [vmem:[%s347_s1 + $0xc0] sm:$0xff]  ;;  %61 = vst [vmem:[#allocation1 + $0x1] ss:$4 sm:$0xff] %v16_v16  ;;  %v42_v21 = vld [vmem:[%s347_s1 + $0xb8] sm:$0xff]  ;;  %v25_v22 = vld [vmem:[%s347_s1 + $0x30] sm:$0xff] }
   0x9   :  { %93 = vmatpush.msra.mxu1 %v47_v7  ;;  %63 = vst [vmem:[#allocation1 + $0x2] ss:$4 sm:$0xff] %v17_v17  ;;  %v41_v23 = vld [vmem:[%s347_s1 + $0xb0] sm:$0xff]  ;;  %v24_v24 = vld [vmem:[%s347_s1 + $0x28] sm:$0xff]  ;;  %v23_v26 = vld [vmem:[%s347_s1 + $0x20] sm:$0xff] }
   0xa   :  { %74 = vmatpush.msra.mxu0 %v30_v8  ;;  %65 = vst [vmem:[#allocation1 + $0x3] ss:$4 sm:$0xff] %v18_v18  ;;  %v40_v25 = vld [vmem:[%s347_s1 + $0xa8] sm:$0xff]  ;;  %v39_v27 = vld [vmem:[%s347_s1 + $0xa0] sm:$0xff]  ;;  %v22_v28 = vld [vmem:[%s347_s1 + $0x18] sm:$0xff] }
   0xb   :  { %94 = vmatpush.msra.mxu1 %v46_v9  ;;  %v38_v29 = vld [vmem:[%s347_s1 + $0x98] sm:$0xff]  ;;  %v21_v30 = vld [vmem:[%s347_s1 + $0x10] sm:$0xff]  ;;  %v20_v32 = vld [vmem:[%s347_s1 + $0x8] sm:$0xff] }
   0xc   :  { %75 = vmatpush.msra.mxu0 %v29_v10  ;;  %v37_v31 = vld [vmem:[%s347_s1 + $0x90] sm:$0xff]  ;;  %v36_v33 = vld [vmem:[%s347_s1 + $0x88] sm:$0xff]  ;;  %v19_v34 = vld [vmem:[%s347_s1] sm:$0xff] }
   0xd   :  { %95 = vmatpush.msra.mxu1 %v45_v11  ;;  %v35_v36 = vld [vmem:[%s347_s1 + $0x80] sm:$0xff]  ;;  %s208_s1 = smov 16  }
   0xe   :  { %76 = vmatpush.msra.mxu0 %v28_v12  ;;  %v175_v38 = vld [vmem:[%s348_s2] ss:$0 sm:$0xff] }
   0xf   :  { %96 = vmatpush.msra.mxu1 %v44_v15 }
  0x10   :  { %77 = vmatpush.msra.mxu0 %v27_v13 }
  0x11   :  { %97 = vmatpush.msra.mxu1 %v43_v19  ;;  %v66_v35 = vld.sshfl [vmem:[#allocation1] sm:$0xff pattern:$0x73625140]  ;;  %v67_v37 = vld.sshfl [vmem:[#allocation1 + $0x8] sm:$0xff pattern:$0x73625140] }
  0x12   :  { %78 = vmatpush.msra.mxu0 %v26_v20 }
  0x13   :  { %98 = vmatpush.msra.mxu1 %v42_v21 }
  0x14   :  { %79 = vmatpush.msra.mxu0 %v25_v22 }
  0x15   :  { %99 = vmatpush.msra.mxu1 %v41_v23 }
  0x16   :  { %80 = vmatpush.msra.mxu0 %v24_v24 }
  0x17   :  { %100 = vmatpush.msra.mxu1 %v40_v25 }
  0x18   :  { %81 = vmatpush.msra.mxu0 %v23_v26 }
  0x19   :  { %101 = vmatpush.msra.mxu1 %v39_v27 }
  0x1a   :  { %82 = vmatpush.msra.mxu0 %v22_v28 }
  0x1b   :  { %102 = vmatpush.msra.mxu1 %v38_v29 }
  0x1c   :  { %83 = vmatpush.msra.mxu0 %v21_v30 }
  0x1d   :  { %103 = vmatpush.msra.mxu1 %v37_v31 }
  0x1e   :  { %84 = vmatpush.msra.mxu0 %v20_v32 }
  0x1f   :  { %104 = vmatpush.msra.mxu1 %v36_v33 }
  0x20   :  { %85 = vmatpush.msra.mxu0 %v19_v34 }
  0x21   :  { %86 = vmatmul.f32.vlgmr.msra.gmra.mxu0 %v66_v35  ;;  %105 = vmatpush.msra.mxu1 %v35_v36 }
  0x22   :  { %106 = vmatmul.f32.vlgmr.msra.gmra.mxu1 %v67_v37 }
  0x9e   :  { %v87_v39 = vpop.f32.mrf.mxu0 }
  0x9f   :  { %v88_v40 = vadd.f32 %v175_v38, %v87_v39  ;;  %v107_v41 = vpop.f32.mrf.mxu1 }
  0xa1   :  { %v108_v42 = vadd.f32 %v107_v41, %v88_v40 }
  0xa3   :  { %v111_v43 = vand.u32 2147483647, %v108_v42  ;;  %v110_v49 = vmax.f32 %v108_v42, 0.0 }
  0xa5   :  { %v112_v44 = vsub.f32 0.0, %v111_v43 }
  0xa7   :  { %v113_v45 = vmul.f32 1.442695, %v112_v44 }
  0xa9   :  { %176 = vpow2.f32 %v113_v45 }
  0xaf   :  { %v177_v46 = vpop.eup %176 }
  0xb0   :  { %v115_v47 = vadd.f32 1.0, %v177_v46 }
  0xb2   :  { %178 = vlog2.f32 %v115_v47 }
  0xb8   :  { %v179_v48 = vpop.eup %178 }
  0xb9   :  { %v117_v50 = vmul.f32 0.6931472, %v179_v48 }
  0xbb   :  { %v118_v51 = vadd.f32 %v117_v50, %v110_v49 }
  0xbd   :  { %v119_v52 = vmax.f32 %v118_v51, 1e-30 }
  0xbf   :  { %v120_v53 = vmin.f32 %v119_v52, 1.0 }
  0xc1   :  { %v121_v54 = vmul.f32 0.035868343, %v120_v53  ;;  %144 = vst.msk [vmem:[#allocation2] sm:$0xff] %vm143_vm0, %v120_v53 }
  0xc3   :  { %v122_v55 = vadd.f32 -0.19352782, %v121_v54 }
  0xc5   :  { %v123_v56 = vmul.f32 %v122_v55, %v120_v53 }
  0xc7   :  { %v124_v57 = vadd.f32 0.4821994, %v123_v56 }
  0xc9   :  { %v125_v58 = vmul.f32 %v124_v57, %v120_v53 }
  0xcb   :  { %v126_v59 = vadd.f32 -0.7567041, %v125_v58 }
  0xcd   :  { %v127_v60 = vmul.f32 %v126_v59, %v120_v53 }
  0xcf   :  { %v128_v61 = vadd.f32 0.9182069, %v127_v60 }
  0xd1   :  { %v129_v62 = vmul.f32 %v128_v61, %v120_v53 }
  0xd3   :  { %v130_v63 = vadd.f32 -0.89705694, %v129_v62 }
  0xd5   :  { %v131_v0 = vmul.f32 %v130_v63, %v120_v53 }
  0xd7   :  { %v132_v1 = vadd.f32 0.9882059, %v131_v0 }
  0xd9   :  { %v133_v2 = vmul.f32 %v132_v1, %v120_v53 }
  0xdb   :  { %v134_v3 = vadd.f32 -0.57719165, %v133_v2 }
  0xdd   :  { %v135_v4 = vmul.f32 %v134_v3, %v120_v53 }
  0xdf   :  { %v136_v5 = vadd.f32 1.0, %v135_v4 }
  0xe1   :  { %180 = vrcp.f32 %v136_v5 }
  0xe7   :  { %v181_v6 = vpop.eup %180 }
  0xe8   :  { %139 = vrot.lane.b32.xlu0 %v181_v6, %s208_s1 }
  0xf0   :  { %148 = vrot.lane.b32.xlu0 %v119_v52, %s208_s1 }
 0x15a   :  { %v140_v7 = vpop.permute.xlu0 %139 }
 0x15b   :  { %v142_v8 = vmul.f32 %v140_v7, %v119_v52 }
 0x15d   :  { %146 = vst.msk [vmem:[#allocation2] sm:$0xff] %vm145_vm1, %v142_v8 }
 0x162   :  { %v149_v9 = vpop.permute.xlu0 %148 }
 0x163   :  { %152 = vst.msk [vmem:[#allocation2] sm:$0xff] %vm151_vm2, %v149_v9 }
 0x164   :  { %156 = vsyncadd [#allocation3], 96  ;;  %s159_s4 = sshll.u32 %s349_s3, 4  ;;  %s209_s5 = smov [#allocation2]   ;;  %s160_s4 = int_to_ptr.hbm [resolvable:$true] %s159_s4 }
 0x165   :  { %s157_s6 = sshll.u32 %s209_s5, 4  ;;  %s210_s7 = smov 32   ;;  %s158_s6 = int_to_ptr.vmem [resolvable:$true] %s157_s6 }
 0x166   :  { %s211_s8 = smov 2  }
 0x167   :  { %165 = dma.vmem_to_hbm [thread:$0]  %s158_s6, 32, %s160_s4, [#allocation3], %s210_s7, %s210_s7, %s211_s8  }
 0x168   :  { %206 = dma.done.wait [#allocation3], 128  }
 0x169   :  { %207 = vsyncadd [#allocation3], 4294967168 }
 0x16a   :  { %170 = vsyncpa [#allocation3], 1 }

</bundles_post_ra>
